<compile_context>
chip_gen: v5e
topology: v5e:2x2
jax: 0.10.0
libtpu: 0.0.40
codegen_flags: <defaults>
</compile_context>

<pallas_src>
import functools
import math

import jax
import jax.numpy as jnp
from jax.experimental import pallas as pl
from jax.experimental.pallas import tpu as pltpu


def _round_up(a, b):
    return (a + b - 1) // b * b


# ---------------------------------------------------------------------------
# Kernel 1: fused conv-as-matmul + BN scale/shift (+ residual) + ReLU
# ---------------------------------------------------------------------------
def _mm_bn_kernel(x_ref, w_ref, s_ref, b_ref, o_ref, acc_ref, *, relu):
    k = pl.program_id(2)

    @pl.when(k == 0)
    def _():
        acc_ref[...] = jnp.zeros_like(acc_ref)

    acc_ref[...] += jnp.dot(x_ref[...], w_ref[...],
                            preferred_element_type=jnp.float32)

    @pl.when(k == pl.num_programs(2) - 1)
    def _():
        y = acc_ref[...] * s_ref[...] + b_ref[...]
        if relu:
            y = jnp.maximum(y, 0.0)
        o_ref[...] = y.astype(o_ref.dtype)


def _mm_bn_res_kernel(x_ref, w_ref, s_ref, b_ref, r_ref, o_ref, acc_ref, *,
                      relu):
    k = pl.program_id(2)

    @pl.when(k == 0)
    def _():
        acc_ref[...] = jnp.zeros_like(acc_ref)

    acc_ref[...] += jnp.dot(x_ref[...], w_ref[...],
                            preferred_element_type=jnp.float32)

    @pl.when(k == pl.num_programs(2) - 1)
    def _():
        y = acc_ref[...] * s_ref[...] + b_ref[...] + r_ref[...]
        if relu:
            y = jnp.maximum(y, 0.0)
        o_ref[...] = y.astype(o_ref.dtype)


def fused_matmul_bn(x, w, scale, bias, *, relu, residual=None):
    """out = [relu]( (x @ w) * scale + bias [+ residual] )  on the MXU."""
    M, K = x.shape
    K2, N = w.shape
    assert K == K2
    tm = min(256, _round_up(M, 8))
    tn = min(256, _round_up(N, 128))
    tk = min(512, _round_up(K, 128))
    Mp, Kp, Np = _round_up(M, tm), _round_up(K, tk), _round_up(N, tn)

    # bf16 matmul operands (native MXU path), f32 accumulation in VMEM scratch.
    xp = jnp.zeros((Mp, Kp), jnp.bfloat16).at[:M, :K].set(x.astype(jnp.bfloat16))
    wp = jnp.zeros((Kp, Np), jnp.bfloat16).at[:K, :N].set(w.astype(jnp.bfloat16))
    sp = jnp.zeros((1, Np), jnp.float32).at[:, :N].set(
        scale.astype(jnp.float32).reshape(1, N))
    bp = jnp.zeros((1, Np), jnp.float32).at[:, :N].set(
        bias.astype(jnp.float32).reshape(1, N))

    in_specs = [
        pl.BlockSpec((tm, tk), lambda i, j, k: (i, k)),
        pl.BlockSpec((tk, tn), lambda i, j, k: (k, j)),
        pl.BlockSpec((1, tn), lambda i, j, k: (0, j)),
        pl.BlockSpec((1, tn), lambda i, j, k: (0, j)),
    ]
    args = [xp, wp, sp, bp]
    if residual is None:
        kernel = functools.partial(_mm_bn_kernel, relu=relu)
    else:
        rp = jnp.zeros((Mp, Np), jnp.float32).at[:M, :N].set(
            residual.astype(jnp.float32))
        in_specs.append(pl.BlockSpec((tm, tn), lambda i, j, k: (i, j)))
        args.append(rp)
        kernel = functools.partial(_mm_bn_res_kernel, relu=relu)

    out = pl.pallas_call(
        kernel,
        out_shape=jax.ShapeDtypeStruct((Mp, Np), jnp.float32),
        grid=(Mp // tm, Np // tn, Kp // tk),
        in_specs=in_specs,
        out_specs=pl.BlockSpec((tm, tn), lambda i, j, k: (i, j)),
        scratch_shapes=[pltpu.VMEM((tm, tn), jnp.float32)],
        compiler_params=pltpu.CompilerParams(
            dimension_semantics=("parallel", "parallel", "arbitrary")),
    )(*args)
    return out[:M, :N]


# ---------------------------------------------------------------------------
# Kernel 2: max over the k*k pooling-window slices (MaxPool2d 3x3 / s2 / p1)
# ---------------------------------------------------------------------------
def _window_max_kernel(x_ref, o_ref):
    o_ref[...] = jnp.max(x_ref[...], axis=0)


def maxpool_2d(x, ksize=3, stride=2, pad=1):
    N, H, W, C = x.shape
    xp = jnp.pad(x, ((0, 0), (pad, pad), (pad, pad), (0, 0)),
                 constant_values=-1e30)
    Ho = (H + 2 * pad - ksize) // stride + 1
    Wo = (W + 2 * pad - ksize) // stride + 1
    M = N * Ho * Wo
    slices = [
        xp[:, i:i + (Ho - 1) * stride + 1:stride,
           j:j + (Wo - 1) * stride + 1:stride, :].reshape(M, C)
        for i in range(ksize) for j in range(ksize)
    ]
    stacked = jnp.stack(slices, axis=0)                 # (k*k, M, C)
    tm = min(512, _round_up(M, 8))
    Mp = _round_up(M, tm)
    if Mp != M:
        stacked = jnp.pad(stacked, ((0, 0), (0, Mp - M), (0, 0)))
    out = pl.pallas_call(
        _window_max_kernel,
        out_shape=jax.ShapeDtypeStruct((Mp, C), jnp.float32),
        grid=(Mp // tm,),
        in_specs=[pl.BlockSpec((ksize * ksize, tm, C), lambda i: (0, i, 0))],
        out_specs=pl.BlockSpec((tm, C), lambda i: (i, 0)),
        compiler_params=pltpu.CompilerParams(
            dimension_semantics=("parallel",)),
    )(stacked)
    return out[:M].reshape(N, Ho, Wo, C)


# ---------------------------------------------------------------------------
# Kernel 3: global average pool over spatial positions
# ---------------------------------------------------------------------------
def _avgpool_kernel(x_ref, o_ref):
    o_ref[...] = jnp.mean(x_ref[...], axis=1)


def global_avg_pool(x):
    N, H, W, C = x.shape
    x3 = x.reshape(N, H * W, C)
    return pl.pallas_call(
        _avgpool_kernel,
        out_shape=jax.ShapeDtypeStruct((N, C), jnp.float32),
        grid=(1,),
        in_specs=[pl.BlockSpec((N, H * W, C), lambda i: (0, 0, 0))],
        out_specs=pl.BlockSpec((N, C), lambda i: (0, 0)),
    )(x3)


# ---------------------------------------------------------------------------
# im2col (pure layout plumbing: pad + strided slices + concat)
# ---------------------------------------------------------------------------
def _im2col(x, kh, kw, stride, pad):
    N, H, W, C = x.shape
    xp = jnp.pad(x, ((0, 0), (pad, pad), (pad, pad), (0, 0)))
    Ho = (H + 2 * pad - kh) // stride + 1
    Wo = (W + 2 * pad - kw) // stride + 1
    cols = [
        xp[:, i:i + (Ho - 1) * stride + 1:stride,
           j:j + (Wo - 1) * stride + 1:stride, :]
        for i in range(kh) for j in range(kw)
    ]
    patches = jnp.concatenate(cols, axis=-1)            # (N, Ho, Wo, kh*kw*C)
    return patches.reshape(N * Ho * Wo, kh * kw * C), Ho, Wo


# ---------------------------------------------------------------------------
# Parameter construction (conv weight + inference-mode BN folded scale/shift)
# ---------------------------------------------------------------------------
def _make_conv_bn(key, kh, kw, cin, cout, eps=1e-5):
    std = math.sqrt(2.0 / (kh * kw * cin))
    w = std * jax.random.normal(key, (kh * kw * cin, cout), jnp.float32)
    gamma = jnp.ones((cout,), jnp.float32)
    beta = jnp.zeros((cout,), jnp.float32)
    rmean = jnp.zeros((cout,), jnp.float32)
    rvar = jnp.ones((cout,), jnp.float32)
    scale = gamma / jnp.sqrt(rvar + eps)
    bias = beta - rmean * scale
    return dict(w=w, scale=scale, bias=bias)


def make_resnet_params(key, layers=(3, 4, 6, 3), last_stride=1):
    keys = iter(jax.random.split(key, 128))
    params = {'stem': _make_conv_bn(next(keys), 7, 7, 3, 64), 'stages': []}
    inplanes = 64
    plan = zip((64, 128, 256, 512), layers, (1, 2, 2, last_stride))
    for planes, nblocks, stride in plan:
        stage = []
        for b in range(nblocks):
            s = stride if b == 0 else 1
            blk = {
                'stride': s,
                'conv1': _make_conv_bn(next(keys), 1, 1, inplanes, planes),
                'conv2': _make_conv_bn(next(keys), 3, 3, planes, planes),
                'conv3': _make_conv_bn(next(keys), 1, 1, planes, planes * 4),
            }
            if s != 1 or inplanes != planes * 4:
                blk['downsample'] = _make_conv_bn(next(keys), 1, 1, inplanes,
                                                  planes * 4)
            stage.append(blk)
            inplanes = planes * 4
        params['stages'].append(stage)
    return params


# ---------------------------------------------------------------------------
# Forward pass
# ---------------------------------------------------------------------------
def _bottleneck_forward(x, p):
    N, H, W, Cin = x.shape
    s = p['stride']
    planes = p['conv1']['w'].shape[1]

    # conv1 1x1 + BN + ReLU
    h = fused_matmul_bn(x.reshape(N * H * W, Cin), p['conv1']['w'],
                        p['conv1']['scale'], p['conv1']['bias'],
                        relu=True).reshape(N, H, W, planes)
    # conv2 3x3 (stride s, pad 1) + BN + ReLU
    cols, Ho, Wo = _im2col(h, 3, 3, s, 1)
    h = fused_matmul_bn(cols, p['conv2']['w'], p['conv2']['scale'],
                        p['conv2']['bias'],
                        relu=True).reshape(N, Ho, Wo, planes)
    # residual branch
    if 'downsample' in p:
        xd = x[:, ::s, ::s, :] if s > 1 else x
        res = fused_matmul_bn(xd.reshape(N * Ho * Wo, Cin),
                              p['downsample']['w'], p['downsample']['scale'],
                              p['downsample']['bias'], relu=False)
    else:
        res = x.reshape(N * Ho * Wo, Cin)
    # conv3 1x1 + BN + residual add + ReLU (all fused in one kernel epilogue)
    out = fused_matmul_bn(h.reshape(N * Ho * Wo, planes), p['conv3']['w'],
                          p['conv3']['scale'], p['conv3']['bias'],
                          relu=True, residual=res)
    return out.reshape(N, Ho, Wo, planes * 4)


def resnet_builder_forward(params, x_nchw):
    x = jnp.transpose(x_nchw, (0, 2, 3, 1)).astype(jnp.float32)   # NHWC
    N = x.shape[0]
    # stem: conv 7x7/s2/p3 + BN + ReLU, then maxpool 3x3/s2/p1
    cols, Ho, Wo = _im2col(x, 7, 7, 2, 3)
    p = params['stem']
    out = fused_matmul_bn(cols, p['w'], p['scale'], p['bias'],
                          relu=True).reshape(N, Ho, Wo, 64)
    out = maxpool_2d(out, ksize=3, stride=2, pad=1)
    # residual stages
    for stage in params['stages']:
        for blk in stage:
            out = _bottleneck_forward(out, blk)
    # global average pool + flatten -> (N, 2048) global feature
    return global_avg_pool(out)


if __name__ == "__main__":
    key = jax.random.PRNGKey(0)
    k_x, k_p = jax.random.split(key)
    # Small input consistent with the module: (batch=2, channels=3, 32x32)
    x = jax.random.normal(k_x, (2, 3, 32, 32), jnp.float32)
    params = make_resnet_params(k_p, layers=(3, 4, 6, 3), last_stride=1)

    feat = resnet_builder_forward(params, x)
    feat = jax.block_until_ready(feat)

    assert feat.shape == (2, 2048), feat.shape
    assert bool(jnp.all(jnp.isfinite(feat)))
    print("KERNEL_OK")
</pallas_src>

<mosaic_0001>
module attributes {stable_mosaic.version = 11 : i64} {
  func.func @_mm_bn_kernel(%arg0: i32, %arg1: i32, %arg2: i32, %arg3: memref<256x256xbf16, #tpu.memory_space<vmem>>, %arg4: memref<256x128xbf16, #tpu.memory_space<vmem>>, %arg5: memref<1x128xf32, #tpu.memory_space<vmem>>, %arg6: memref<1x128xf32, #tpu.memory_space<vmem>>, %arg7: memref<256x128xf32, #tpu.memory_space<vmem>>, %arg8: memref<256x128xf32, #tpu.memory_space<vmem>>) attributes {dimension_semantics = [#tpu.dimension_semantics<parallel>, #tpu.dimension_semantics<parallel>, #tpu.dimension_semantics<arbitrary>], iteration_bounds = array<i64: 2, 1, 1>, scalar_prefetch = 0 : i64, scratch_operands = 1 : i64, tpu.core_type = #tpu.core_type<tc>, window_params = [{transform_indices = @transform_0, window_bounds = array<i64: 256, 256>}, {transform_indices = @transform_1, window_bounds = array<i64: 256, 128>}, {transform_indices = @transform_2, window_bounds = array<i64: 1, 128>}, {transform_indices = @transform_3, window_bounds = array<i64: 1, 128>}, {transform_indices = @transform_4, window_bounds = array<i64: 256, 128>}]} {
    %c0_i32 = arith.constant 0 : i32
    %0 = arith.cmpi eq, %arg2, %c0_i32 : i32
    %1 = arith.extui %0 : i1 to i32
    %c0_i32_0 = arith.constant 0 : i32
    %2 = arith.cmpi ne, %1, %c0_i32_0 : i32
    scf.if %2 {
      %cst_10 = arith.constant 0.000000e+00 : f32
      %12 = vector.broadcast %cst_10 : f32 to vector<256x128xf32>
      %c0_11 = arith.constant 0 : index
      %c0_12 = arith.constant 0 : index
      %13 = vector.load %arg8[%c0_11, %c0_12] : memref<256x128xf32, #tpu.memory_space<vmem>>, vector<256x128xf32>
      tpu.vector_store %arg8[%c0_11, %c0_12], %12 {strides = array<i32>} : memref<256x128xf32, #tpu.memory_space<vmem>>, vector<256x128xf32>,
    } else {
    }
    %c0 = arith.constant 0 : index
    %c0_1 = arith.constant 0 : index
    %3 = vector.load %arg8[%c0, %c0_1] : memref<256x128xf32, #tpu.memory_space<vmem>>, vector<256x128xf32>
    %c0_2 = arith.constant 0 : index
    %c0_3 = arith.constant 0 : index
    %4 = vector.load %arg3[%c0_2, %c0_3] : memref<256x256xbf16, #tpu.memory_space<vmem>>, vector<256x256xbf16>
    %c0_4 = arith.constant 0 : index
    %c0_5 = arith.constant 0 : index
    %5 = vector.load %arg4[%c0_4, %c0_5] : memref<256x128xbf16, #tpu.memory_space<vmem>>, vector<256x128xbf16>
    %cst = arith.constant dense<0.000000e+00> : vector<256x128xf32>
    %6 = tpu.matmul %4, %5, %cst {dimension_numbers = #tpu.dot_dimension_numbers<[1], [0], [0], [1], [0, 0, 1, 1], [], []>} : vector<256x256xbf16>, vector<256x128xbf16>, vector<256x128xf32> -> vector<256x128xf32>
    %7 = arith.addf %3, %6 : vector<256x128xf32>
    %c0_6 = arith.constant 0 : index
    %c0_7 = arith.constant 0 : index
    %8 = vector.load %arg8[%c0_6, %c0_7] : memref<256x128xf32, #tpu.memory_space<vmem>>, vector<256x128xf32>
    tpu.vector_store %arg8[%c0_6, %c0_7], %7 {strides = array<i32>} : memref<256x128xf32, #tpu.memory_space<vmem>>, vector<256x128xf32>,
    %c0_i32_8 = arith.constant 0 : i32
    %9 = arith.cmpi eq, %arg2, %c0_i32_8 : i32
    %10 = arith.extui %9 : i1 to i32
    %c0_i32_9 = arith.constant 0 : i32
    %11 = arith.cmpi ne, %10, %c0_i32_9 : i32
    scf.if %11 {
      %c0_10 = arith.constant 0 : index
      %c0_11 = arith.constant 0 : index
      %12 = vector.load %arg8[%c0_10, %c0_11] : memref<256x128xf32, #tpu.memory_space<vmem>>, vector<256x128xf32>
      %c0_12 = arith.constant 0 : index
      %c0_13 = arith.constant 0 : index
      %13 = vector.load %arg5[%c0_12, %c0_13] : memref<1x128xf32, #tpu.memory_space<vmem>>, vector<1x128xf32>
      %14 = vector.broadcast %13 : vector<1x128xf32> to vector<256x128xf32>
      %15 = arith.mulf %12, %14 : vector<256x128xf32>
      %c0_14 = arith.constant 0 : index
      %c0_15 = arith.constant 0 : index
      %16 = vector.load %arg6[%c0_14, %c0_15] : memref<1x128xf32, #tpu.memory_space<vmem>>, vector<1x128xf32>
      %17 = vector.broadcast %16 : vector<1x128xf32> to vector<256x128xf32>
      %18 = arith.addf %15, %17 : vector<256x128xf32>
      %cst_16 = arith.constant 0.000000e+00 : f32
      %19 = vector.broadcast %cst_16 : f32 to vector<256x128xf32>
      %20 = arith.maximumf %18, %19 : vector<256x128xf32>
      %c0_17 = arith.constant 0 : index
      %c0_18 = arith.constant 0 : index
      %21 = vector.load %arg7[%c0_17, %c0_18] : memref<256x128xf32, #tpu.memory_space<vmem>>, vector<256x128xf32>
      tpu.vector_store %arg7[%c0_17, %c0_18], %20 {strides = array<i32>} : memref<256x128xf32, #tpu.memory_space<vmem>>, vector<256x128xf32>,
    } else {
    }
    return
  }
  func.func @transform_0(%arg0: i32, %arg1: i32, %arg2: i32) -> (i32, i32) {
    %c0_i32 = arith.constant 0 : i32
    return %arg0, %arg2 : i32, i32
  }
  func.func @transform_1(%arg0: i32, %arg1: i32, %arg2: i32) -> (i32, i32) {
    %c0_i32 = arith.constant 0 : i32
    return %arg2, %arg1 : i32, i32
  }
  func.func @transform_2(%arg0: i32, %arg1: i32, %arg2: i32) -> (i32, i32) {
    %c0_i32 = arith.constant 0 : i32
    %c0_i32_0 = arith.constant 0 : i32
    return %c0_i32, %arg1 : i32, i32
  }
  func.func @transform_3(%arg0: i32, %arg1: i32, %arg2: i32) -> (i32, i32) {
    %c0_i32 = arith.constant 0 : i32
    %c0_i32_0 = arith.constant 0 : i32
    return %c0_i32, %arg1 : i32, i32
  }
  func.func @transform_4(%arg0: i32, %arg1: i32, %arg2: i32) -> (i32, i32) {
    %c0_i32 = arith.constant 0 : i32
    return %arg0, %arg1 : i32, i32
  }
}

</mosaic_0001>

<bundles_post_ra>
// kernel: tpu_custom_call.1
= control target key start
LH: loop header
LB: loop body
LE: loop exit
PB: predicated region body
PF: predicated region fallthrough
CT: control target
= control target key end

     0   :  { %s2117_s0 = inlined_call_operand.hbm [shape: bf16[512,256], index: 0, kind: input, shape index: {}]   ;;  %s2118_s1 = inlined_call_operand.hbm [shape: bf16[256,128], index: 1, kind: input, shape index: {}]   ;;  %s2119_s2 = inlined_call_operand.vmem [shape: f32[1,128], index: 2, kind: input, shape index: {}]   ;;  %s2120_s3 = inlined_call_operand.vmem [shape: f32[1,128], index: 3, kind: input, shape index: {}]   ;;  %s2121_s4 = inlined_call_operand.hbm [shape: f32[512,128], index: 4, kind: output, shape index: {}]  }
   0x1   :  { %2123 = sst [smem:[#allocation13_spill]] %s2118_s1 }
   0x2   :  { %9 = vsyncpa [#allocation4], 0 }
   0x3   :  { %11 = vsyncpa [#allocation4 + $0x1], 0 }
   0x4   :  { %12 = vsyncpa [#allocation7], 0 }
   0x5   :  { %13 = vsyncpa [#allocation5], 0 }
   0x6   :  { %15 = vsyncpa [#allocation5 + $0x1], 0  ;;  %s1789_s15 = smov 0   ;;  %s1791_s16 = smov 0  }
   0x7   :  { %s1793_s17 = smov 0   ;;  %s1795_s18 = smov 0  }
   0x8   :  { %s1797_s19 = smov 0   ;;  %s1799_s20 = smov 0  }
   0x9 LB: > { %s1249_s21 = sadd.s32 4294967295, %s1755_s20   ;;  %s1250_s22 = sadd.s32 4294967294, %s1755_s20   ;;  %s1755_s20 = sphi %s1799_s20, %s21_s20   ;;  %s1751_s19 = sphi %s1797_s19, %s2138_s19   ;;  %s1747_s18 = sphi %s1795_s18, %s2137_s18   ;;  %s1743_s17 = sphi %s1793_s17, %s2136_s17   ;;  %s1739_s16 = sphi %s1791_s16, %s2135_s16   ;;  %s1735_s15 = sphi %s1789_s15, %s2134_s15  }
   0xa   : > { %p62_p0 = scmp.ne.s32.totalorder %s1739_s16, %s1735_s15  ;;  %p1823_p1 = scmp.eq.s32.totalorder %s1249_s21, 0 }
   0xb   : > { %p1827_p2 = scmp.eq.s32.totalorder %s1249_s21, 1  ;;  %p174_p3 = scmp.eq.s32.totalorder %s1250_s22, 1 }
   0xc   : > { %p1833_p4 = por %p1823_p1, %p62_p0  ;;  %p1251_p5 = scmp.ge.s32.totalorder %s1755_s20, 1 }
   0xd   : > { %p1838_p6 = por %p174_p3, %p62_p0  ;;  %p181_p7 = scmp.lt.s32.totalorder %s1755_s20, 3 }
   0xe   : > { %s2128_s1 = sld [smem:[#allocation13_spill]]  ;;  %s1757_s5 = smov [#allocation6]  }
   0xf   : > { %p1846_p8 = pnand %p1251_p5, %p181_p7  ;;  %s198_s6 = sshll.u32 %s1757_s5, 4  ;;  %s199_s6 = int_to_ptr.vmem [resolvable:$true] %s198_s6 }
  0x10   : > { %p1255_p11 = scmp.ge.s32.totalorder %s1755_s20, 2  ;;  %s1758_s7 = smov 64  }
  0x11   : > { %p1536_p9 = pneg %p1846_p8  ;;  %s1759_s8 = smov 4  }
  0x12   : > { %s40_s9 = sadd.s32 1, %s1751_s19  ;;  %s49_s10 = sadd.s32 1, %s1743_s17 }
  0x13   : > { %p1537_p10 = pnand %p1536_p9, %p1823_p1  ;;  %p42_p12 = scmp.ge.s32.totalorder %s40_s9, 2 }
  0x14   : > { %s196_s29 = sshll.u32 %s2128_s1, 4  ;;  %p56_p13 = scmp.ne.s32.totalorder %s1743_s17, %s1739_s16  ;;  %s197_s29 = int_to_ptr.hbm [resolvable:$true] %s196_s29 }
  0x15   : > { %1539 = dma.hbm_to_vmem [thread:$0]  (!%p1537_p10), %s197_s29, 2048, %s199_s6, [#allocation7], %s1758_s7, %s1758_s7, %s1759_s8  }
  0x16   : > { %p57_p0 = scmp.eq.s32.totalorder %s1755_s20, 0  ;;  %s2140_s9 = smov (%p42_p12, %s40_s9), 0 }
  0x17   : > { %2130 = sst [smem:[#allocation12_spill]] %s2140_s9  ;;  %p1868_p5 = por %p1827_p2, %p56_p13 }
  0x18   : > { %p1862_p3 = por %p57_p0, %p56_p13  ;;  %s44_s13 = ssub.s32 %s1751_s19, %s2140_s9 }
  0x19   : > { %p1549_p7 = scmp.lt.s32.totalorder %s1755_s20, 2  ;;  %p47_p9 = scmp.eq.s32.totalorder %s44_s13, 0 }
  0x1a   : > { %s224_s14 = sand.u32 1, %s1743_s17   ;;  %s1462_s27 = sshll.u32 %s1751_s19, 8 }
  0x1b   : > { %s1256_s21 = sshll.u32 %s224_s14, 8  ;;  %s236_s5 = scalar_lea.hbm %s2117_s0, %s1462_s27 }
  0x1c   : > { %s1877_s22 = scalar_select %p47_p9, %s1743_s17, %s49_s10  }
  0x1d   : > { %s228_s6 = scalar_lea.vmem [#allocation3], %s1256_s21  ;;  %s237_s24 = sshll.u32 %s236_s5, 4  ;;  %s238_s24 = int_to_ptr.hbm [resolvable:$true] %s237_s24 }
  0x1e   : > { %s239_s7 = sshll.u32 %s228_s6, 4  ;;  %p1541_p2 = pnand %p1549_p7, %p1862_p3  ;;  %s240_s7 = int_to_ptr.vmem [resolvable:$true] %s239_s7 }
  0x1f   : > { %s225_s8 = scalar_lea.sflag [#allocation4], %s224_s14  ;;  %s1760_s1 = smov 128  }
  0x20   : > { %s1761_s9 = smov 8   ;;  %251 = sbr.rel (%p1846_p8) target bundleno = 337 (0x151), region = 36 }
  0x21   : > { %1543 = dma.hbm_to_vmem [thread:$0]  (!%p1541_p2), %s238_s24, 4096, %s240_s7, %s225_s8, %s1760_s1, %s1760_s1, %s1761_s9  }
  0x22   : > { %s1888_s10 = sand.u32 (!%p1846_p8), 1, %s1739_s16  }
  0x23   : > { %s1261_s13 = sshll.u32 (!%p1846_p8), %s1888_s10, 8  ;;  %s254_s21 = scalar_lea.sflag (!%p1846_p8), [#allocation4], %s1888_s10 }
  0x24   : > { %s1894_s27 = scalar_lea.vmem (!%p1846_p8), [#allocation3], %s1261_s13 }
  0x25   : > { %1722 = dma.done.wait (%p1833_p4), %s254_s21, 4096  }
  0x26   : > { %1724 = vsyncadd (%p1833_p4), %s254_s21, 4294963200 }
  0x27   : > { %1726 = dma.done.wait (%p1823_p1), [#allocation7], 2048  }
  0x28   : > { %1728 = vsyncadd (%p1823_p1), [#allocation7], 4294965248  ;;  %v1502_v0 = vld [vmem:[#allocation6 + $0x38] sm:$0xff]  ;;  %v1501_v2 = vld [vmem:[#allocation6 + $0x30] sm:$0xff]  ;;  %s1982_s9 = scalar_lea.vmem [#allocation8], %s1261_s13  ;;  %s1511_s11 = sshll.u32 %s1747_s18, 8 }
  0x29   : > { %v1510_v1 = vld [vmem:[#allocation6 + $0x78] sm:$0xff]  ;;  %692 = vmatpush.bf16.msra.mxu0 %v1502_v0  ;;  %1512 = vmatpush.bf16.msra.mxu2 %v1502_v0  ;;  %v1509_v3 = vld [vmem:[#allocation6 + $0x70] sm:$0xff]  ;;  %v1500_v4 = vld [vmem:[#allocation6 + $0x28] sm:$0xff]  ;;  %s1118_s29 = scalar_lea.hbm %s2121_s4, %s1511_s11  ;;  %s1119_s5 = sshll.u32 %s1982_s9, 4  ;;  %s1120_s5 = int_to_ptr.vmem [resolvable:$true] %s1119_s5 }
  0x2a   : > { %781 = vmatpush.bf16.msra.mxu1 %v1510_v1  ;;  %1520 = vmatpush.bf16.msra.mxu3 %v1510_v1  ;;  %v1508_v5 = vld [vmem:[#allocation6 + $0x68] sm:$0xff]  ;;  %v1499_v6 = vld [vmem:[#allocation6 + $0x20] sm:$0xff]  ;;  %v1498_v8 = vld [vmem:[#allocation6 + $0x18] sm:$0xff]  ;;  %s1121_s18 = sshll.u32 %s1118_s29, 4  ;;  %s1106_s6 = scalar_lea.sflag [#allocation5], %s1888_s10  ;;  %s1122_s18 = int_to_ptr.hbm [resolvable:$true] %s1121_s18 }
  0x2b   : > { %v1507_v7 = vld [vmem:[#allocation6 + $0x60] sm:$0xff]  ;;  %v1506_v9 = vld [vmem:[#allocation6 + $0x58] sm:$0xff]  ;;  %v1497_v10 = vld [vmem:[#allocation6 + $0x10] sm:$0xff]  ;;  %s1683_s7 = sshra.s32 %s1122_s18, 4  ;;  %s1689_s21 = scalar_lea.hbm %s2121_s4, 512  ;;  %s1684_s7 = int_to_ptr.hbm [resolvable:$true] %s1683_s7 }
  0x2c   : > { %v1505_v11 = vld [vmem:[#allocation6 + $0x50] sm:$0xff]  ;;  %v1496_v12 = vld [vmem:[#allocation6 + $0x8] sm:$0xff]  ;;  %v1495_v14 = vld [vmem:[#allocation6] sm:$0xff]  ;;  %s1685_s24 = scalar_lea.hbm %s1684_s7, 256  ;;  %p1690_p10 = scmp.lt.s32.totalorder %s1684_s7, %s2121_s4 }
  0x2d   : > { %693 = vmatpush.bf16.msra.mxu0 %v1501_v2  ;;  %1513 = vmatpush.bf16.msra.mxu2 %v1501_v2  ;;  %v1504_v13 = vld [vmem:[#allocation6 + $0x48] sm:$0xff]  ;;  %v1503_v15 = vld [vmem:[#allocation6 + $0x40] sm:$0xff]  ;;  %v1274_v28 = vld [vmem:[%s1894_s27 + $0x10] sm:$0xf]  ;;  %p1686_p1 = scmp.ne.s32.totalorder %s1684_s7, %s1685_s24  ;;  %p1691_p12 = scmp.lt.s32.totalorder %s1689_s21, %s1685_s24 }
  0x2e   : > { %782 = vmatpush.bf16.msra.mxu1 %v1509_v3  ;;  %1521 = vmatpush.bf16.msra.mxu3 %v1509_v3  ;;  %v1266_v16 = vld [vmem:[%s1894_s27] sm:$0xf]  ;;  %v1464_v17 = vld [vmem:[%s1894_s27 + $0x4] sm:$0xf0]  ;;  %v1463_v20 = vld [vmem:[%s1894_s27 + $0x4] sm:$0xf] }
  0x2f   : > { %v1330_v18 = vld [vmem:[%s1894_s27 + $0x80] sm:$0xf]  ;;  %v1480_v19 = vld [vmem:[%s1894_s27 + $0x84] sm:$0xf0]  ;;  %v1268_v21 = vld [vmem:[%s1894_s27 + $0x8] sm:$0xf0]  ;;  %v1267_v24 = vor.u32 %v1464_v17, %v1266_v16  ;;  %p1687_p4 = pnand %p1686_p1, %p1868_p5  ;;  %p1692_p13 = por %p1691_p12, %p1690_p10 }
  0x30   : > { %v1479_v22 = vld [vmem:[%s1894_s27 + $0x84] sm:$0xf]  ;;  %v1332_v23 = vld [vmem:[%s1894_s27 + $0x88] sm:$0xf0]  ;;  %v1331_v25 = vor.u32 %v1480_v19, %v1330_v18  ;;  %v1271_v26 = vor.u32 %v1463_v20, %v1268_v21  ;;  %v1466_v29 = vld [vmem:[%s1894_s27 + $0x14] sm:$0xf0] }
  0x31   : > { %694 = vmatpush.bf16.msra.mxu0 %v1500_v4  ;;  %1514 = vmatpush.bf16.msra.mxu2 %v1500_v4  ;;  %v1335_v27 = vor.u32 %v1479_v22, %v1332_v23  ;;  %v1338_v30 = vld [vmem:[%s1894_s27 + $0x90] sm:$0xf]  ;;  %v1482_v31 = vld [vmem:[%s1894_s27 + $0x94] sm:$0xf0]  ;;  %v1465_v32 = vld [vmem:[%s1894_s27 + $0x14] sm:$0xf]  ;;  %v1275_v36 = vor.u32 %v1466_v29, %v1274_v28  ;;  %p1688_p8 = pneg %p1687_p4 }
  0x32   : > { %783 = vmatpush.bf16.msra.mxu1 %v1508_v5  ;;  %1522 = vmatpush.bf16.msra.mxu3 %v1508_v5  ;;  %v1276_v33 = vld [vmem:[%s1894_s27 + $0x18] sm:$0xf0]  ;;  %v1481_v34 = vld [vmem:[%s1894_s27 + $0x94] sm:$0xf]  ;;  %v1339_v37 = vor.u32 %v1482_v31, %v1338_v30  ;;  %v1282_v40 = vld [vmem:[%s1894_s27 + $0x20] sm:$0xf] }
  0x33   : > { %v1340_v35 = vld [vmem:[%s1894_s27 + $0x98] sm:$0xf0]  ;;  %v1279_v38 = vor.u32 %v1465_v32, %v1276_v33  ;;  %v1468_v41 = vld [vmem:[%s1894_s27 + $0x24] sm:$0xf0]  ;;  %v1346_v42 = vld [vmem:[%s1894_s27 + $0xa0] sm:$0xf]  ;;  %p1693_p0 = pnand %p1692_p13, %p1688_p8 }
  0x34   : > { %v1343_v39 = vor.u32 %v1481_v34, %v1340_v35  ;;  %v1484_v43 = vld [vmem:[%s1894_s27 + $0xa4] sm:$0xf0]  ;;  %v1467_v44 = vld [vmem:[%s1894_s27 + $0x24] sm:$0xf]  ;;  %v1284_v45 = vld [vmem:[%s1894_s27 + $0x28] sm:$0xf0]  ;;  %v1283_v48 = vor.u32 %v1468_v41, %v1282_v40 }
  0x35   : > { %695 = vmatpush.bf16.msra.mxu0 %v1499_v6  ;;  %1515 = vmatpush.bf16.msra.mxu2 %v1499_v6  ;;  %v1483_v46 = vld [vmem:[%s1894_s27 + $0xa4] sm:$0xf]  ;;  %v1348_v47 = vld [vmem:[%s1894_s27 + $0xa8] sm:$0xf0]  ;;  %v1347_v49 = vor.u32 %v1484_v43, %v1346_v42  ;;  %v1287_v50 = vor.u32 %v1467_v44, %v1284_v45  ;;  %v1290_v52 = vld [vmem:[%s1894_s27 + $0x30] sm:$0xf] }
  0x36   : > { %784 = vmatpush.bf16.msra.mxu1 %v1507_v7  ;;  %1523 = vmatpush.bf16.msra.mxu3 %v1507_v7  ;;  %v1351_v51 = vor.u32 %v1483_v46, %v1348_v47  ;;  %v1470_v53 = vld [vmem:[%s1894_s27 + $0x34] sm:$0xf0]  ;;  %v1354_v54 = vld [vmem:[%s1894_s27 + $0xb0] sm:$0xf]  ;;  %v1469_v56 = vld [vmem:[%s1894_s27 + $0x34] sm:$0xf] }
  0x37   : > { %v1486_v55 = vld [vmem:[%s1894_s27 + $0xb4] sm:$0xf0]  ;;  %v1292_v57 = vld [vmem:[%s1894_s27 + $0x38] sm:$0xf0]  ;;  %v1485_v58 = vld [vmem:[%s1894_s27 + $0xb4] sm:$0xf]  ;;  %v1291_v60 = vor.u32 %v1470_v53, %v1290_v52 }
  0x38   : > { %v1356_v59 = vld [vmem:[%s1894_s27 + $0xb8] sm:$0xf0]  ;;  %v1355_v61 = vor.u32 %v1486_v55, %v1354_v54  ;;  %v1295_v62 = vor.u32 %v1469_v56, %v1292_v57  ;;  %v1298_v0 = vld [vmem:[%s1894_s27 + $0x40] sm:$0xf]  ;;  %v1472_v1 = vld [vmem:[%s1894_s27 + $0x44] sm:$0xf0] }
  0x39   : > { %696 = vmatpush.bf16.msra.mxu0 %v1498_v8  ;;  %1516 = vmatpush.bf16.msra.mxu2 %v1498_v8  ;;  %v1359_v63 = vor.u32 %v1485_v58, %v1356_v59  ;;  %v1362_v2 = vld [vmem:[%s1894_s27 + $0xc0] sm:$0xf]  ;;  %v1488_v3 = vld [vmem:[%s1894_s27 + $0xc4] sm:$0xf0]  ;;  %v1471_v4 = vld [vmem:[%s1894_s27 + $0x44] sm:$0xf]  ;;  %v1299_v8 = vor.u32 %v1472_v1, %v1298_v0 }
  0x3a   : > { %785 = vmatpush.bf16.msra.mxu1 %v1506_v9  ;;  %1524 = vmatpush.bf16.msra.mxu3 %v1506_v9  ;;  %v1300_v5 = vld [vmem:[%s1894_s27 + $0x48] sm:$0xf0]  ;;  %v1487_v6 = vld [vmem:[%s1894_s27 + $0xc4] sm:$0xf]  ;;  %v1363_v9 = vor.u32 %v1488_v3, %v1362_v2  ;;  %v1473_v16 = vld [vmem:[%s1894_s27 + $0x54] sm:$0xf] }
  0x3b   : > { %v1364_v7 = vld [vmem:[%s1894_s27 + $0xc8] sm:$0xf0]  ;;  %v1308_v17 = vld [vmem:[%s1894_s27 + $0x58] sm:$0xf0]  ;;  %v1489_v18 = vld [vmem:[%s1894_s27 + $0xd4] sm:$0xf] }
  0x3c   : > { %v1372_v19 = vld [vmem:[%s1894_s27 + $0xd8] sm:$0xf0]  ;;  %v1311_v22 = vor.u32 %v1473_v16, %v1308_v17  ;;  %v1475_v28 = vld [vmem:[%s1894_s27 + $0x64] sm:$0xf]  ;;  %v1316_v29 = vld [vmem:[%s1894_s27 + $0x68] sm:$0xf0] }
  0x3d   : > { %697 = vmatpush.bf16.msra.mxu0 %v1497_v10  ;;  %1517 = vmatpush.bf16.msra.mxu2 %v1497_v10  ;;  %v1303_v10 = vor.u32 %v1471_v4, %v1300_v5  ;;  %v1375_v23 = vor.u32 %v1489_v18, %v1372_v19  ;;  %v1491_v30 = vld [vmem:[%s1894_s27 + $0xe4] sm:$0xf]  ;;  %v1380_v31 = vld [vmem:[%s1894_s27 + $0xe8] sm:$0xf0]  ;;  %v1319_v34 = vor.u32 %v1475_v28, %v1316_v29  ;;  %v1477_v40 = vld [vmem:[%s1894_s27 + $0x74] sm:$0xf] }
  0x3e   : > { %786 = vmatpush.bf16.msra.mxu1 %v1505_v11  ;;  %1525 = vmatpush.bf16.msra.mxu3 %v1505_v11  ;;  %v1367_v11 = vor.u32 %v1487_v6, %v1364_v7  ;;  %v1383_v35 = vor.u32 %v1491_v30, %v1380_v31  ;;  %v1324_v41 = vld [vmem:[%s1894_s27 + $0x78] sm:$0xf0]  ;;  %v1493_v42 = vld [vmem:[%s1894_s27 + $0xf4] sm:$0xf]  ;;  %v1976_v52 = vld [vmem:[%s2120_s3] ss:$0 sm:$0xff] }
  0x3f   : > { %v1388_v43 = vld [vmem:[%s1894_s27 + $0xf8] sm:$0xf0]  ;;  %v1327_v46 = vor.u32 %v1477_v40, %v1324_v41 }
  0x40   : > { %v1391_v47 = vor.u32 %v1493_v42, %v1388_v43 }
  0x41   : > { %698 = vmatpush.bf16.msra.mxu0 %v1496_v12  ;;  %1518 = vmatpush.bf16.msra.mxu2 %v1496_v12  ;;  %v1306_v12 = vld [vmem:[%s1894_s27 + $0x50] sm:$0xf] }
  0x42   : > { %787 = vmatpush.bf16.msra.mxu1 %v1504_v13  ;;  %1526 = vmatpush.bf16.msra.mxu3 %v1504_v13  ;;  %v1474_v13 = vld [vmem:[%s1894_s27 + $0x54] sm:$0xf0] }
  0x43   : > { %v1307_v20 = vor.u32 %v1474_v13, %v1306_v12 }
  0x45   : > { %699 = vmatpush.bf16.msra.mxu0 %v1495_v14  ;;  %1519 = vmatpush.bf16.msra.mxu2 %v1495_v14  ;;  %v1370_v14 = vld [vmem:[%s1894_s27 + $0xd0] sm:$0xf] }
  0x46   : > { %788 = vmatpush.bf16.msra.mxu1 %v1503_v15  ;;  %1527 = vmatpush.bf16.msra.mxu3 %v1503_v15  ;;  %v1490_v15 = vld [vmem:[%s1894_s27 + $0xd4] sm:$0xf0] }
  0x47   : > { %v1371_v21 = vor.u32 %v1490_v15, %v1370_v14 }
  0x48   : > { %700 = vmatmul.bf16.vlgmr.msra.gmra.mxu0 %v1267_v24  ;;  %740 = vmatmul.bf16.vlgmr.msra.gmra.mxu2 %v1331_v25  ;;  %v1314_v24 = vld [vmem:[%s1894_s27 + $0x60] sm:$0xf]  ;;  %v1476_v25 = vld [vmem:[%s1894_s27 + $0x64] sm:$0xf0] }
  0x49   : > { %789 = vmatmul.bf16.vlgmr.msra.gmra.mxu1 %v1271_v26  ;;  %829 = vmatmul.bf16.vlgmr.msra.gmra.mxu3 %v1335_v27  ;;  %v1378_v26 = vld [vmem:[%s1894_s27 + $0xe0] sm:$0xf]  ;;  %v1492_v27 = vld [vmem:[%s1894_s27 + $0xe4] sm:$0xf0]  ;;  %v1315_v32 = vor.u32 %v1476_v25, %v1314_v24 }
  0x4a   : > { %v1379_v33 = vor.u32 %v1492_v27, %v1378_v26 }
  0x58   : > { %705 = vmatmul.bf16.gmra.mxu0 %v1275_v36  ;;  %745 = vmatmul.bf16.gmra.mxu2 %v1339_v37  ;;  %v1322_v36 = vld [vmem:[%s1894_s27 + $0x70] sm:$0xf]  ;;  %v1478_v37 = vld [vmem:[%s1894_s27 + $0x74] sm:$0xf0] }
  0x59   : > { %794 = vmatmul.bf16.gmra.mxu1 %v1279_v38  ;;  %834 = vmatmul.bf16.gmra.mxu3 %v1343_v39  ;;  %v1386_v38 = vld [vmem:[%s1894_s27 + $0xf0] sm:$0xf]  ;;  %v1494_v39 = vld [vmem:[%s1894_s27 + $0xf4] sm:$0xf0]  ;;  %v1323_v44 = vor.u32 %v1478_v37, %v1322_v36 }
  0x5a   : > { %v1387_v45 = vor.u32 %v1494_v39, %v1386_v38 }
  0x68   : > { %710 = vmatmul.bf16.gmra.mxu0 %v1283_v48  ;;  %750 = vmatmul.bf16.gmra.mxu2 %v1347_v49  ;;  %v1971_v49 = vld [vmem:[%s2119_s2] ss:$0 sm:$0xff] }
  0x69   : > { %799 = vmatmul.bf16.gmra.mxu1 %v1287_v50  ;;  %839 = vmatmul.bf16.gmra.mxu3 %v1351_v51 }
  0x78   : > { %715 = vmatmul.bf16.gmra.mxu0 %v1291_v60  ;;  %755 = vmatmul.bf16.gmra.mxu2 %v1355_v61 }
  0x79   : > { %804 = vmatmul.bf16.gmra.mxu1 %v1295_v62  ;;  %844 = vmatmul.bf16.gmra.mxu3 %v1359_v63 }
  0x88   : > { %720 = vmatmul.bf16.gmra.mxu0 %v1299_v8  ;;  %760 = vmatmul.bf16.gmra.mxu2 %v1363_v9 }
  0x89   : > { %809 = vmatmul.bf16.gmra.mxu1 %v1303_v10  ;;  %849 = vmatmul.bf16.gmra.mxu3 %v1367_v11 }
  0x98   : > { %725 = vmatmul.bf16.gmra.mxu0 %v1307_v20  ;;  %765 = vmatmul.bf16.gmra.mxu2 %v1371_v21 }
  0x99   : > { %814 = vmatmul.bf16.gmra.mxu1 %v1311_v22  ;;  %854 = vmatmul.bf16.gmra.mxu3 %v1375_v23 }
  0xa8   : > { %730 = vmatmul.bf16.gmra.mxu0 %v1315_v32  ;;  %770 = vmatmul.bf16.gmra.mxu2 %v1379_v33 }
  0xa9   : > { %819 = vmatmul.bf16.gmra.mxu1 %v1319_v34  ;;  %859 = vmatmul.bf16.gmra.mxu3 %v1383_v35 }
  0xb8   : > { %735 = vmatmul.bf16.gmra.mxu0 %v1323_v44  ;;  %775 = vmatmul.bf16.gmra.mxu2 %v1387_v45 }
  0xb9   : > { %824 = vmatmul.bf16.gmra.mxu1 %v1327_v46  ;;  %864 = vmatmul.bf16.gmra.mxu3 %v1391_v47 }
  0xc5   : > { %v701_v48 = vpop.f32.mrf.mxu0 }
  0xc6   : > { %v790_v50 = vpop.f32.mrf.mxu1 }
  0xc7   : > { %v791_v51 = vadd.f32 %v790_v50, %v701_v48 }
  0xc9   : > { %v973_v53 = vmul.f32 %v1971_v49, %v791_v51 }
  0xcb   : > { %v1009_v54 = vadd.f32 %v1976_v52, %v973_v53  ;;  %v741_v55 = vpop.f32.mrf.mxu2 }
  0xcc   : > { %v830_v56 = vpop.f32.mrf.mxu3 }
  0xcd   : > { %v1041_v57 = vmax.f32 %v1009_v54, 0.0  ;;  %v831_v58 = vadd.f32 %v830_v56, %v741_v55  ;;  %v703_v59 = vpop.f32.mrf.mxu0 }
  0xce   : > { %v792_v60 = vpop.f32.mrf.mxu1 }
  0xcf   : > { %1073 = vst [vmem:[%s1982_s9] sm:$0xff] %v1041_v57  ;;  %v989_v61 = vmul.f32 %v1971_v49, %v831_v58  ;;  %v793_v62 = vadd.f32 %v792_v60, %v703_v59 }
  0xd1   : > { %v1025_v63 = vadd.f32 %v1976_v52, %v989_v61  ;;  %v974_v0 = vmul.f32 %v1971_v49, %v793_v62 }
  0xd3   : > { %v1057_v1 = vmax.f32 %v1025_v63, 0.0  ;;  %v1010_v2 = vadd.f32 %v1976_v52, %v974_v0  ;;  %v743_v3 = vpop.f32.mrf.mxu2 }
  0xd4   : > { %v832_v4 = vpop.f32.mrf.mxu3 }
  0xd5   : > { %1089 = vst [vmem:[%s1982_s9 + $0x80] sm:$0xff] %v1057_v1  ;;  %v1042_v5 = vmax.f32 %v1010_v2, 0.0  ;;  %v833_v6 = vadd.f32 %v832_v4, %v743_v3  ;;  %v706_v7 = vpop.f32.mrf.mxu0 }
  0xd6   : > { %v795_v8 = vpop.f32.mrf.mxu1 }
  0xd7   : > { %1074 = vst [vmem:[%s1982_s9 + $0x8] sm:$0xff] %v1042_v5  ;;  %v990_v9 = vmul.f32 %v1971_v49, %v833_v6  ;;  %v796_v10 = vadd.f32 %v795_v8, %v706_v7 }
  0xd9   : > { %v1026_v11 = vadd.f32 %v1976_v52, %v990_v9  ;;  %v975_v12 = vmul.f32 %v1971_v49, %v796_v10 }
  0xdb   : > { %v1058_v13 = vmax.f32 %v1026_v11, 0.0  ;;  %v1011_v14 = vadd.f32 %v1976_v52, %v975_v12  ;;  %v746_v15 = vpop.f32.mrf.mxu2 }
  0xdc   : > { %v835_v16 = vpop.f32.mrf.mxu3 }
  0xdd   : > { %1090 = vst [vmem:[%s1982_s9 + $0x88] sm:$0xff] %v1058_v13  ;;  %v1043_v17 = vmax.f32 %v1011_v14, 0.0  ;;  %v836_v18 = vadd.f32 %v835_v16, %v746_v15  ;;  %v708_v19 = vpop.f32.mrf.mxu0 }
  0xde   : > { %v797_v20 = vpop.f32.mrf.mxu1 }
  0xdf   : > { %1075 = vst [vmem:[%s1982_s9 + $0x10] sm:$0xff] %v1043_v17  ;;  %v991_v21 = vmul.f32 %v1971_v49, %v836_v18  ;;  %v798_v22 = vadd.f32 %v797_v20, %v708_v19 }
  0xe1   : > { %v1027_v23 = vadd.f32 %v1976_v52, %v991_v21  ;;  %v976_v24 = vmul.f32 %v1971_v49, %v798_v22 }
  0xe3   : > { %v1059_v25 = vmax.f32 %v1027_v23, 0.0  ;;  %v1012_v26 = vadd.f32 %v1976_v52, %v976_v24  ;;  %v748_v27 = vpop.f32.mrf.mxu2 }
  0xe4   : > { %v837_v28 = vpop.f32.mrf.mxu3 }
  0xe5   : > { %1091 = vst [vmem:[%s1982_s9 + $0x90] sm:$0xff] %v1059_v25  ;;  %v1044_v29 = vmax.f32 %v1012_v26, 0.0  ;;  %v838_v30 = vadd.f32 %v837_v28, %v748_v27  ;;  %v711_v31 = vpop.f32.mrf.mxu0 }
  0xe6   : > { %v800_v32 = vpop.f32.mrf.mxu1 }
  0xe7   : > { %1076 = vst [vmem:[%s1982_s9 + $0x18] sm:$0xff] %v1044_v29  ;;  %v992_v33 = vmul.f32 %v1971_v49, %v838_v30  ;;  %v801_v34 = vadd.f32 %v800_v32, %v711_v31 }
  0xe9   : > { %v1028_v35 = vadd.f32 %v1976_v52, %v992_v33  ;;  %v977_v36 = vmul.f32 %v1971_v49, %v801_v34 }
  0xeb   : > { %v1060_v37 = vmax.f32 %v1028_v35, 0.0  ;;  %v1013_v38 = vadd.f32 %v1976_v52, %v977_v36  ;;  %v751_v39 = vpop.f32.mrf.mxu2 }
  0xec   : > { %v840_v40 = vpop.f32.mrf.mxu3 }
  0xed   : > { %1092 = vst [vmem:[%s1982_s9 + $0x98] sm:$0xff] %v1060_v37  ;;  %v1045_v41 = vmax.f32 %v1013_v38, 0.0  ;;  %v841_v42 = vadd.f32 %v840_v40, %v751_v39  ;;  %v713_v43 = vpop.f32.mrf.mxu0 }
  0xee   : > { %v802_v44 = vpop.f32.mrf.mxu1 }
  0xef   : > { %1077 = vst [vmem:[%s1982_s9 + $0x20] sm:$0xff] %v1045_v41  ;;  %v993_v45 = vmul.f32 %v1971_v49, %v841_v42  ;;  %v803_v46 = vadd.f32 %v802_v44, %v713_v43 }
  0xf1   : > { %v1029_v47 = vadd.f32 %v1976_v52, %v993_v45  ;;  %v978_v48 = vmul.f32 %v1971_v49, %v803_v46 }
  0xf3   : > { %v1061_v50 = vmax.f32 %v1029_v47, 0.0  ;;  %v1014_v51 = vadd.f32 %v1976_v52, %v978_v48  ;;  %v753_v53 = vpop.f32.mrf.mxu2 }
  0xf4   : > { %v842_v54 = vpop.f32.mrf.mxu3 }
  0xf5   : > { %1093 = vst [vmem:[%s1982_s9 + $0xa0] sm:$0xff] %v1061_v50  ;;  %v1046_v55 = vmax.f32 %v1014_v51, 0.0  ;;  %v843_v56 = vadd.f32 %v842_v54, %v753_v53  ;;  %v716_v57 = vpop.f32.mrf.mxu0 }
  0xf6   : > { %v805_v58 = vpop.f32.mrf.mxu1 }
  0xf7   : > { %1078 = vst [vmem:[%s1982_s9 + $0x28] sm:$0xff] %v1046_v55  ;;  %v994_v59 = vmul.f32 %v1971_v49, %v843_v56  ;;  %v806_v60 = vadd.f32 %v805_v58, %v716_v57 }
  0xf9   : > { %v1030_v61 = vadd.f32 %v1976_v52, %v994_v59  ;;  %v979_v62 = vmul.f32 %v1971_v49, %v806_v60 }
  0xfb   : > { %v1062_v63 = vmax.f32 %v1030_v61, 0.0  ;;  %v1015_v0 = vadd.f32 %v1976_v52, %v979_v62  ;;  %v756_v1 = vpop.f32.mrf.mxu2 }
  0xfc   : > { %v845_v2 = vpop.f32.mrf.mxu3 }
  0xfd   : > { %1094 = vst [vmem:[%s1982_s9 + $0xa8] sm:$0xff] %v1062_v63  ;;  %v1047_v3 = vmax.f32 %v1015_v0, 0.0  ;;  %v846_v4 = vadd.f32 %v845_v2, %v756_v1  ;;  %v718_v5 = vpop.f32.mrf.mxu0 }
  0xfe   : > { %v807_v6 = vpop.f32.mrf.mxu1 }
  0xff   : > { %1079 = vst [vmem:[%s1982_s9 + $0x30] sm:$0xff] %v1047_v3  ;;  %v995_v7 = vmul.f32 %v1971_v49, %v846_v4  ;;  %v808_v8 = vadd.f32 %v807_v6, %v718_v5 }
 0x101   : > { %v1031_v9 = vadd.f32 %v1976_v52, %v995_v7  ;;  %v980_v10 = vmul.f32 %v1971_v49, %v808_v8 }
 0x103   : > { %v1063_v11 = vmax.f32 %v1031_v9, 0.0  ;;  %v1016_v12 = vadd.f32 %v1976_v52, %v980_v10  ;;  %v758_v13 = vpop.f32.mrf.mxu2 }
 0x104   : > { %v847_v14 = vpop.f32.mrf.mxu3 }
 0x105   : > { %1095 = vst [vmem:[%s1982_s9 + $0xb0] sm:$0xff] %v1063_v11  ;;  %v1048_v15 = vmax.f32 %v1016_v12, 0.0  ;;  %v848_v16 = vadd.f32 %v847_v14, %v758_v13  ;;  %v721_v17 = vpop.f32.mrf.mxu0 }
 0x106   : > { %v810_v18 = vpop.f32.mrf.mxu1 }
 0x107   : > { %1080 = vst [vmem:[%s1982_s9 + $0x38] sm:$0xff] %v1048_v15  ;;  %v996_v19 = vmul.f32 %v1971_v49, %v848_v16  ;;  %v811_v20 = vadd.f32 %v810_v18, %v721_v17 }
 0x109   : > { %v1032_v21 = vadd.f32 %v1976_v52, %v996_v19  ;;  %v981_v22 = vmul.f32 %v1971_v49, %v811_v20 }
 0x10b   : > { %v1064_v23 = vmax.f32 %v1032_v21, 0.0  ;;  %v1017_v24 = vadd.f32 %v1976_v52, %v981_v22  ;;  %v761_v25 = vpop.f32.mrf.mxu2 }
 0x10c   : > { %v850_v26 = vpop.f32.mrf.mxu3 }
 0x10d   : > { %1096 = vst [vmem:[%s1982_s9 + $0xb8] sm:$0xff] %v1064_v23  ;;  %v1049_v27 = vmax.f32 %v1017_v24, 0.0  ;;  %v851_v28 = vadd.f32 %v850_v26, %v761_v25  ;;  %v723_v29 = vpop.f32.mrf.mxu0 }
 0x10e   : > { %v812_v30 = vpop.f32.mrf.mxu1 }
 0x10f   : > { %1081 = vst [vmem:[%s1982_s9 + $0x40] sm:$0xff] %v1049_v27  ;;  %v997_v31 = vmul.f32 %v1971_v49, %v851_v28  ;;  %v813_v32 = vadd.f32 %v812_v30, %v723_v29 }
 0x111   : > { %v1033_v33 = vadd.f32 %v1976_v52, %v997_v31  ;;  %v982_v34 = vmul.f32 %v1971_v49, %v813_v32 }
 0x113   : > { %v1065_v35 = vmax.f32 %v1033_v33, 0.0  ;;  %v1018_v36 = vadd.f32 %v1976_v52, %v982_v34  ;;  %v763_v37 = vpop.f32.mrf.mxu2 }
 0x114   : > { %v852_v38 = vpop.f32.mrf.mxu3 }
 0x115   : > { %1097 = vst [vmem:[%s1982_s9 + $0xc0] sm:$0xff] %v1065_v35  ;;  %v1050_v39 = vmax.f32 %v1018_v36, 0.0  ;;  %v853_v40 = vadd.f32 %v852_v38, %v763_v37  ;;  %v726_v41 = vpop.f32.mrf.mxu0 }
 0x116   : > { %v815_v42 = vpop.f32.mrf.mxu1 }
 0x117   : > { %1082 = vst [vmem:[%s1982_s9 + $0x48] sm:$0xff] %v1050_v39  ;;  %v998_v43 = vmul.f32 %v1971_v49, %v853_v40  ;;  %v816_v44 = vadd.f32 %v815_v42, %v726_v41 }
 0x119   : > { %v1034_v45 = vadd.f32 %v1976_v52, %v998_v43  ;;  %v983_v46 = vmul.f32 %v1971_v49, %v816_v44 }
 0x11b   : > { %v1066_v47 = vmax.f32 %v1034_v45, 0.0  ;;  %v1019_v48 = vadd.f32 %v1976_v52, %v983_v46  ;;  %v766_v50 = vpop.f32.mrf.mxu2 }
 0x11c   : > { %v855_v51 = vpop.f32.mrf.mxu3 }
 0x11d   : > { %1098 = vst [vmem:[%s1982_s9 + $0xc8] sm:$0xff] %v1066_v47  ;;  %v1051_v53 = vmax.f32 %v1019_v48, 0.0  ;;  %v856_v54 = vadd.f32 %v855_v51, %v766_v50  ;;  %v728_v55 = vpop.f32.mrf.mxu0 }
 0x11e   : > { %v817_v56 = vpop.f32.mrf.mxu1 }
 0x11f   : > { %1083 = vst [vmem:[%s1982_s9 + $0x50] sm:$0xff] %v1051_v53  ;;  %v999_v57 = vmul.f32 %v1971_v49, %v856_v54  ;;  %v818_v58 = vadd.f32 %v817_v56, %v728_v55 }
 0x121   : > { %v1035_v59 = vadd.f32 %v1976_v52, %v999_v57  ;;  %v984_v60 = vmul.f32 %v1971_v49, %v818_v58 }
 0x123   : > { %v1067_v61 = vmax.f32 %v1035_v59, 0.0  ;;  %v1020_v62 = vadd.f32 %v1976_v52, %v984_v60  ;;  %v768_v63 = vpop.f32.mrf.mxu2 }
 0x124   : > { %v857_v0 = vpop.f32.mrf.mxu3 }
 0x125   : > { %1099 = vst [vmem:[%s1982_s9 + $0xd0] sm:$0xff] %v1067_v61  ;;  %v1052_v1 = vmax.f32 %v1020_v62, 0.0  ;;  %v858_v2 = vadd.f32 %v857_v0, %v768_v63  ;;  %v731_v3 = vpop.f32.mrf.mxu0 }
 0x126   : > { %v820_v4 = vpop.f32.mrf.mxu1 }
 0x127   : > { %1084 = vst [vmem:[%s1982_s9 + $0x58] sm:$0xff] %v1052_v1  ;;  %v1000_v5 = vmul.f32 %v1971_v49, %v858_v2  ;;  %v821_v6 = vadd.f32 %v820_v4, %v731_v3 }
 0x129   : > { %v1036_v7 = vadd.f32 %v1976_v52, %v1000_v5  ;;  %v985_v8 = vmul.f32 %v1971_v49, %v821_v6 }
 0x12b   : > { %v1068_v9 = vmax.f32 %v1036_v7, 0.0  ;;  %v1021_v10 = vadd.f32 %v1976_v52, %v985_v8  ;;  %v771_v11 = vpop.f32.mrf.mxu2 }
 0x12c   : > { %v860_v12 = vpop.f32.mrf.mxu3 }
 0x12d   : > { %1100 = vst [vmem:[%s1982_s9 + $0xd8] sm:$0xff] %v1068_v9  ;;  %v1053_v13 = vmax.f32 %v1021_v10, 0.0  ;;  %v861_v14 = vadd.f32 %v860_v12, %v771_v11  ;;  %v733_v15 = vpop.f32.mrf.mxu0 }
 0x12e   : > { %v822_v16 = vpop.f32.mrf.mxu1 }
 0x12f   : > { %1085 = vst [vmem:[%s1982_s9 + $0x60] sm:$0xff] %v1053_v13  ;;  %v1001_v17 = vmul.f32 %v1971_v49, %v861_v14  ;;  %v823_v18 = vadd.f32 %v822_v16, %v733_v15 }
 0x131   : > { %v1037_v19 = vadd.f32 %v1976_v52, %v1001_v17  ;;  %v986_v20 = vmul.f32 %v1971_v49, %v823_v18 }
 0x133   : > { %v1069_v21 = vmax.f32 %v1037_v19, 0.0  ;;  %v1022_v22 = vadd.f32 %v1976_v52, %v986_v20  ;;  %v773_v23 = vpop.f32.mrf.mxu2 }
 0x134   : > { %v862_v24 = vpop.f32.mrf.mxu3 }
 0x135   : > { %1101 = vst [vmem:[%s1982_s9 + $0xe0] sm:$0xff] %v1069_v21  ;;  %v1054_v25 = vmax.f32 %v1022_v22, 0.0  ;;  %v863_v26 = vadd.f32 %v862_v24, %v773_v23  ;;  %v736_v27 = vpop.f32.mrf.mxu0 }
 0x136   : > { %v825_v28 = vpop.f32.mrf.mxu1 }
 0x137   : > { %1086 = vst [vmem:[%s1982_s9 + $0x68] sm:$0xff] %v1054_v25  ;;  %v1002_v29 = vmul.f32 %v1971_v49, %v863_v26  ;;  %v826_v30 = vadd.f32 %v825_v28, %v736_v27 }
 0x139   : > { %v1038_v31 = vadd.f32 %v1976_v52, %v1002_v29  ;;  %v987_v32 = vmul.f32 %v1971_v49, %v826_v30 }
 0x13b   : > { %v1070_v33 = vmax.f32 %v1038_v31, 0.0  ;;  %v1023_v34 = vadd.f32 %v1976_v52, %v987_v32  ;;  %v776_v35 = vpop.f32.mrf.mxu2 }
 0x13c   : > { %v865_v36 = vpop.f32.mrf.mxu3 }
 0x13d   : > { %1102 = vst [vmem:[%s1982_s9 + $0xe8] sm:$0xff] %v1070_v33  ;;  %v1055_v37 = vmax.f32 %v1023_v34, 0.0  ;;  %v866_v38 = vadd.f32 %v865_v36, %v776_v35  ;;  %v738_v39 = vpop.f32.mrf.mxu0 }
 0x13e   : > { %v827_v40 = vpop.f32.mrf.mxu1 }
 0x13f   : > { %1087 = vst [vmem:[%s1982_s9 + $0x70] sm:$0xff] %v1055_v37  ;;  %v1003_v41 = vmul.f32 %v1971_v49, %v866_v38  ;;  %v828_v42 = vadd.f32 %v827_v40, %v738_v39 }
 0x141   : > { %v1039_v43 = vadd.f32 %v1976_v52, %v1003_v41  ;;  %v988_v44 = vmul.f32 %v1971_v49, %v828_v42 }
 0x143   : > { %v1071_v45 = vmax.f32 %v1039_v43, 0.0  ;;  %v1024_v46 = vadd.f32 %v1976_v52, %v988_v44  ;;  %v778_v47 = vpop.f32.mrf.mxu2 }
 0x144   : > { %v867_v48 = vpop.f32.mrf.mxu3 }
 0x145   : > { %1103 = vst [vmem:[%s1982_s9 + $0xf0] sm:$0xff] %v1071_v45  ;;  %v1056_v50 = vmax.f32 %v1024_v46, 0.0  ;;  %v868_v51 = vadd.f32 %v867_v48, %v778_v47 }
 0x147   : > { %1088 = vst [vmem:[%s1982_s9 + $0x78] sm:$0xff] %v1056_v50  ;;  %v1004_v53 = vmul.f32 %v1971_v49, %v868_v51 }
 0x149   : > { %v1040_v54 = vadd.f32 %v1976_v52, %v1004_v53 }
 0x14b   : > { %v1072_v55 = vmax.f32 %v1040_v54, 0.0 }
 0x14d   : > { %1104 = vst [vmem:[%s1982_s9 + $0xf8] sm:$0xff] %v1072_v55 }
 0x14e   : > { %1696 = shalt.err (!%p1693_p0)
}
 0x14f   : > { %s1762_s10 = smov 128   ;;  %s1763_s23 = smov 8  }
 0x150   : > { %1534 = dma.vmem_to_hbm [thread:$0]  (%p1868_p5), %s1120_s5, 4096, %s1122_s18, %s1106_s6, %s1762_s10, %s1762_s10, %s1763_s23  }
 0x151 PF: > { %s1136_s25 = sand.u32 1, %s1735_s15   ;;  %p1545_p3 = pnand %p1255_p11, %p1838_p6 }
 0x152   : > { %s1137_s30 = scalar_lea.sflag [#allocation5], %s1136_s25 }
 0x153   : > { %p1546_p7 = pneg %p1545_p3 }
 0x155   : > { %1730 = dma.done.wait (%p1546_p7), %s1137_s30, 4096  }
 0x156   : > { %1732 = vsyncadd (%p1546_p7), %s1137_s30, 4294963200  ;;  %s21_s20 = sadd.s32 1, %s1755_s20   ;;  %s2133_s12 = sld [smem:[#allocation12_spill]] }
 0x157   : > { %p18_p9 = scmp.ge.s32.totalorder %s21_s20, 4   ;;  %s2134_s15 = smov %s1739_s16 }
 0x158   : > { %s2135_s16 = smov %s1743_s17  ;;  %s2136_s17 = smov %s1877_s22 }
 0x159   : > { %s2137_s18 = smov %s1751_s19  ;;  %20 = sbr.rel (!%p18_p9) target bundleno = 9 (0x9), region = 100 }
 0x15c   : > { %s2138_s19 = smov %s2133_s12 }
 0x15e   :  { %1143 = vsyncpa [#allocation4], 1 }
 0x15f   :  { %1145 = vsyncpa [#allocation4 + $0x1], 1 }
 0x160   :  { %1146 = vsyncpa [#allocation7], 1 }
 0x161   :  { %1147 = vsyncpa [#allocation5], 1 }
 0x162   :  { %1149 = vsyncpa [#allocation5 + $0x1], 1 }

</bundles_post_ra>
